<compile_context>
chip_gen: v6e
topology: v6e:2x2x1
jax: 0.10.0
libtpu: 0.0.40
codegen_flags: <defaults>
</compile_context>

<pallas_src>
import functools

import jax
import jax.numpy as jnp
from jax import lax
from jax.experimental import pallas as pl
from jax.experimental.pallas import tpu as pltpu

BN_EPS = 1e-5
H1, H2 = 512, 128  # hidden widths fixed by the PyTorch module


# ---------------------------------------------------------------------------
# Generation-aware VMEM budgeting
# ---------------------------------------------------------------------------

def _usable_vmem_bytes():
    """Scoped-VMEM budget: physical capacity minus ~16 MiB headroom, <=100 MiB."""
    try:
        cap = int(pltpu.get_tpu_info().vmem_capacity_bytes)
    except Exception:  # non-TPU trace / older jax: conservative v7x-sized fallback
        cap = 64 << 20
    return max(16 << 20, min(cap - (16 << 20), 100 << 20))


def _vmem_limit(need_bytes):
    return int(max(16 << 20, min(int(need_bytes), _usable_vmem_bytes())))


# ---------------------------------------------------------------------------
# Fused single-block kernel (whole batch resident in VMEM)
# ---------------------------------------------------------------------------

def _bn_relu(h, gamma, beta, ones_row, inv_n):
    """Training-mode BatchNorm1d + ReLU, single-pass stats.

    Column sums go through the MXU (ones[1,N] @ h) so the saturated VALU slot
    only sees the elementwise square; var = E[h^2] - mean^2 clamped at 0
    against f32 cancellation; rsqrt is an EUP op (free slot).  Epilogue is one
    mul + one add per element.
    """
    s = jnp.dot(ones_row, h, preferred_element_type=jnp.float32)        # [1, C]
    q = jnp.dot(ones_row, h * h, preferred_element_type=jnp.float32)    # [1, C]
    mean = s * inv_n
    var = jnp.maximum(q * inv_n - mean * mean, 0.0)
    scale = gamma * lax.rsqrt(var + BN_EPS)
    shift = beta - mean * scale
    return jnp.maximum(h * scale + shift, 0.0)


def mlp_block_kernel(x_ref, w1_ref, w2_ref, w3_ref, gb_ref, o_ref):
    n = x_ref.shape[0]
    c3p = w3_ref.shape[1]           # padded (lane-dense) output width
    wdt = w1_ref.dtype              # matmul operand dtype (bf16 by default)
    inv_n = 1.0 / n
    ones_row = jnp.ones((1, n), jnp.float32)
    gb = gb_ref[...]                # [2, H1 + H2 + c3p] f32 (row0=gamma, row1=beta)

    # layer 1: fc1 -> bn1 -> relu  (linear bias exactly cancelled by BN)
    h = jnp.dot(x_ref[...], w1_ref[...], preferred_element_type=jnp.float32)
    h = _bn_relu(h, gb[0:1, :H1], gb[1:2, :H1], ones_row, inv_n)
    # layer 2: fc2 -> bn2 -> relu
    h = jnp.dot(h.astype(wdt), w2_ref[...], preferred_element_type=jnp.float32)
    h = _bn_relu(h, gb[0:1, H1:H1 + H2], gb[1:2, H1:H1 + H2], ones_row, inv_n)
    # layer 3: fc3 -> bn3 -> relu  (columns padded to a multiple of 128 -> unmasked vst)
    h = jnp.dot(h.astype(wdt), w3_ref[...], preferred_element_type=jnp.float32)
    h = _bn_relu(h, gb[0:1, H1 + H2:], gb[1:2, H1 + H2:], ones_row, inv_n)

    o_ref[...] = h.astype(o_ref.dtype)


def prepare_params(params, compute_dtype=jnp.bfloat16):
    """One-time host-side prep (NOT per call): transpose, pack, pad.

    - weights -> [C_in, C_out], bf16 by default for the MXU
    - linear biases dropped (cancelled by training-mode BN)
    - gamma/beta of the 3 BN layers packed into one [2, H1+H2+C3p] f32 array
    - layer-3 columns zero-padded so the kernel output is lane-dense
    """
    c3 = params["w3"].shape[0]
    c3_pad = ((c3 + 127) // 128) * 128

    w1 = params["w1"].T.astype(compute_dtype)                        # [in, 512]
    w2 = params["w2"].T.astype(compute_dtype)                        # [512, 128]
    w3 = jnp.zeros((H2, c3_pad), compute_dtype).at[:, :c3].set(
        params["w3"].T.astype(compute_dtype))                        # [128, c3p]

    g3 = jnp.ones((c3_pad,), jnp.float32).at[:c3].set(params["g3"])
    be3 = jnp.zeros((c3_pad,), jnp.float32).at[:c3].set(params["be3"])
    gamma = jnp.concatenate([params["g1"], params["g2"], g3])
    beta = jnp.concatenate([params["be1"], params["be2"], be3])
    gb = jnp.stack([gamma, beta], axis=0).astype(jnp.float32)        # [2, H1+H2+c3p]

    return {"w1": w1, "w2": w2, "w3": w3, "gb": gb}


@functools.partial(jax.jit, static_argnames=("out_channels", "return_padded"))
def mlp_block(x, prep, *, out_channels, return_padded=False):
    """Fused single-call path; whole batch resident in VMEM.
    For batches that don't fit, use mlp_block_tiled.  x: [N, in_channels]."""
    n, in_ch = x.shape
    c3p = prep["w3"].shape[1]
    wdt = prep["w1"].dtype
    x = x.astype(wdt)            # pre-cast outside the kernel (halves x DMA for bf16)
    args = (x, prep["w1"], prep["w2"], prep["w3"], prep["gb"])

    param_bytes = sum(int(a.size) * a.dtype.itemsize for a in args[1:])
    x_bytes = int(x.size) * x.dtype.itemsize
    act_bytes = 4 * n * (H1 + H2 + c3p)          # peak live f32 activations (rough)
    out_bytes = 4 * n * c3p
    need = x_bytes + param_bytes + 2 * act_bytes + out_bytes
    usable = _usable_vmem_bytes()
    if need > usable:
        raise ValueError(
            f"batch of {n} rows needs ~{need >> 20} MiB VMEM (> {usable >> 20} MiB "
            "usable on this TPU generation); use mlp_block_tiled for large N.")

    cost = pl.CostEstimate(
        flops=2 * n * (in_ch * H1 + H1 * H2 + H2 * c3p) + 8 * n * (H1 + H2 + c3p),
        transcendentals=H1 + H2 + c3p,
        bytes_accessed=x_bytes + param_bytes + out_bytes,
    )

    out_padded = pl.pallas_call(
        mlp_block_kernel,
        out_shape=jax.ShapeDtypeStruct((n, c3p), jnp.float32),
        in_specs=[pl.BlockSpec(memory_space=pltpu.MemorySpace.VMEM) for _ in args],
        out_specs=pl.BlockSpec(memory_space=pltpu.MemorySpace.VMEM),
        compiler_params=pltpu.CompilerParams(
            vmem_limit_bytes=_vmem_limit(need + (4 << 20))),
        cost_estimate=cost,
    )(*args)

    if return_padded:
        return out_padded               # lane-dense [N, c3p]; caller slices / fuses
    return out_padded[:, :out_channels]


# ---------------------------------------------------------------------------
# Row-tiled path for large N (exact full-batch BN statistics)
# ---------------------------------------------------------------------------

def _accum_stats(i, hp, stats_ref):
    ones = jnp.ones((1, hp.shape[0]), jnp.float32)
    s = jnp.dot(ones, hp, preferred_element_type=jnp.float32)          # [1, C]
    q = jnp.dot(ones, hp * hp, preferred_element_type=jnp.float32)     # [1, C]
    st = jnp.concatenate([s, q], axis=0)                               # [2, C]

    @pl.when(i == 0)
    def _():
        stats_ref[...] = st

    @pl.when(i != 0)
    def _():
        stats_ref[...] = stats_ref[...] + st


def _matmul_stats_kernel(h_ref, w_ref, hp_ref, stats_ref):
    i = pl.program_id(0)
    hp = jnp.dot(h_ref[...], w_ref[...], preferred_element_type=jnp.float32)
    hp_ref[...] = hp.astype(hp_ref.dtype)
    _accum_stats(i, hp, stats_ref)


def _affine_relu_matmul_stats_kernel(sc_ref, sh_ref, h_ref, w_ref, hp_ref, stats_ref):
    i = pl.program_id(0)
    h = jnp.maximum(h_ref[...].astype(jnp.float32) * sc_ref[...] + sh_ref[...], 0.0)
    hp = jnp.dot(h.astype(w_ref.dtype), w_ref[...], preferred_element_type=jnp.float32)
    hp_ref[...] = hp.astype(hp_ref.dtype)
    _accum_stats(i, hp, stats_ref)


def _affine_relu_kernel(sc_ref, sh_ref, h_ref, o_ref):
    o_ref[...] = jnp.maximum(
        h_ref[...].astype(jnp.float32) * sc_ref[...] + sh_ref[...], 0.0
    ).astype(o_ref.dtype)


def _layer_tiled(h, w, scale, shift, *, row_tile):
    """One row-tiled Linear pass that also accumulates full-batch (sum, sumsq).
    scale/shift == None means first layer (no BN/ReLU prologue)."""
    n, c_in = h.shape
    c_out = w.shape[1]
    grid = (n // row_tile,)
    h_spec = pl.BlockSpec((row_tile, c_in), lambda i: (i, 0))
    w_spec = pl.BlockSpec((c_in, c_out), lambda i: (0, 0))
    hp_spec = pl.BlockSpec((row_tile, c_out), lambda i: (i, 0))
    st_spec = pl.BlockSpec((2, c_out), lambda i: (0, 0))        # resident accumulator
    out_shape = (jax.ShapeDtypeStruct((n, c_out), w.dtype),
                 jax.ShapeDtypeStruct((2, c_out), jnp.float32))
    need = 4 * row_tile * (c_in + c_out) * 4 + int(w.size) * w.dtype.itemsize + (4 << 20)
    cp = pltpu.CompilerParams(dimension_semantics=("arbitrary",),
                              vmem_limit_bytes=_vmem_limit(need))
    if scale is None:
        return pl.pallas_call(
            _matmul_stats_kernel, grid=grid,
            in_specs=[h_spec, w_spec], out_specs=(hp_spec, st_spec),
            out_shape=out_shape, compiler_params=cp)(h, w)
    ss_spec = pl.BlockSpec((1, c_in), lambda i: (0, 0))
    return pl.pallas_call(
        _affine_relu_matmul_stats_kernel, grid=grid,
        in_specs=[ss_spec, ss_spec, h_spec, w_spec],
        out_specs=(hp_spec, st_spec),
        out_shape=out_shape, compiler_params=cp)(scale, shift, h, w)


def _bn_scale_shift(stats, gamma, beta, n):
    mean = stats[0] / n
    var = jnp.maximum(stats[1] / n - mean * mean, 0.0)
    scale = gamma * lax.rsqrt(var + BN_EPS)
    shift = beta - mean * scale
    return scale[None, :].astype(jnp.float32), shift[None, :].astype(jnp.float32)


@functools.partial(jax.jit, static_argnames=("out_channels", "row_tile", "return_padded"))
def mlp_block_tiled(x, prep, *, out_channels, row_tile=1024, return_padded=False):
    """Row-tiled path for batches too large for VMEM residency.

    Each Linear layer is one row-tiled pallas_call (pipelined DMA) that writes
    pre-activations back to HBM in the compute dtype and accumulates the exact
    full-batch (sum, sumsq) across an 'arbitrary' grid axis; the BN scale/shift
    are formed between calls and fused into the next layer's prologue (final
    layer gets a tiled normalize+ReLU pass).  BN statistics stay full-batch.
    """
    # TODO(synk): mask the ragged last row tile instead of requiring divisibility.
    n, _ = x.shape
    if n % row_tile != 0:
        raise ValueError(f"n={n} must be a multiple of row_tile={row_tile}")
    gb = prep["gb"]
    c3p = prep["w3"].shape[1]
    wdt = prep["w1"].dtype
    x = x.astype(wdt)

    h1, st1 = _layer_tiled(x, prep["w1"], None, None, row_tile=row_tile)
    sc1, sh1 = _bn_scale_shift(st1, gb[0, :H1], gb[1, :H1], n)
    h2, st2 = _layer_tiled(h1, prep["w2"], sc1, sh1, row_tile=row_tile)
    sc2, sh2 = _bn_scale_shift(st2, gb[0, H1:H1 + H2], gb[1, H1:H1 + H2], n)
    h3, st3 = _layer_tiled(h2, prep["w3"], sc2, sh2, row_tile=row_tile)
    sc3, sh3 = _bn_scale_shift(st3, gb[0, H1 + H2:], gb[1, H1 + H2:], n)

    # TODO(synk): on v7x, split the row grid across the two TensorCores and
    # combine per-core (sum, sumsq) via CMEM + core_barrier for up to ~2x.
    out_padded = pl.pallas_call(
        _affine_relu_kernel, grid=(n // row_tile,),
        in_specs=[pl.BlockSpec((1, c3p), lambda i: (0, 0)),
                  pl.BlockSpec((1, c3p), lambda i: (0, 0)),
                  pl.BlockSpec((row_tile, c3p), lambda i: (i, 0))],
        out_specs=pl.BlockSpec((row_tile, c3p), lambda i: (i, 0)),
        out_shape=jax.ShapeDtypeStruct((n, c3p), jnp.float32),
        compiler_params=pltpu.CompilerParams(
            dimension_semantics=("parallel",),
            vmem_limit_bytes=_vmem_limit(6 * row_tile * c3p * 4)),
    )(sc3, sh3, h3)

    if return_padded:
        return out_padded
    return out_padded[:, :out_channels]


# ---------------------------------------------------------------------------
# Parameter init + pure-JAX reference (PyTorch-faithful, biases included)
# ---------------------------------------------------------------------------

def init_params(key, in_channels, out_channels):
    ks = jax.random.split(key, 6)

    def linear(kw, kb, fan_in, fan_out):
        bound = 1.0 / jnp.sqrt(fan_in)
        w = jax.random.uniform(kw, (fan_out, fan_in), jnp.float32, -bound, bound)
        b = jax.random.uniform(kb, (fan_out,), jnp.float32, -bound, bound)
        return w, b

    w1, b1 = linear(ks[0], ks[1], in_channels, H1)
    w2, b2 = linear(ks[2], ks[3], H1, H2)
    w3, b3 = linear(ks[4], ks[5], H2, out_channels)

    return {
        "w1": w1, "b1": b1, "g1": jnp.ones((H1,), jnp.float32), "be1": jnp.zeros((H1,), jnp.float32),
        "w2": w2, "b2": b2, "g2": jnp.ones((H2,), jnp.float32), "be2": jnp.zeros((H2,), jnp.float32),
        "w3": w3, "b3": b3, "g3": jnp.ones((out_channels,), jnp.float32),
        "be3": jnp.zeros((out_channels,), jnp.float32),
    }


def _reference(x, p):
    def bn_relu(h, g, b):
        m = jnp.mean(h, axis=0, keepdims=True)
        v = jnp.mean((h - m) ** 2, axis=0, keepdims=True)
        return jnp.maximum((h - m) / jnp.sqrt(v + BN_EPS) * g + b, 0.0)

    h = bn_relu(x @ p["w1"].T + p["b1"], p["g1"], p["be1"])
    h = bn_relu(h @ p["w2"].T + p["b2"], p["g2"], p["be2"])
    h = bn_relu(h @ p["w3"].T + p["b3"], p["g3"], p["be3"])
    return h


if __name__ == "__main__":
    key = jax.random.PRNGKey(0)
    k_x, k_p, k_x2 = jax.random.split(key, 3)

    N, IN_CH, OUT_CH = 8, 16, 64
    x = jax.random.normal(k_x, (N, IN_CH), jnp.float32)
    params = init_params(k_p, IN_CH, OUT_CH)
    ref = _reference(x, params)

    # Opt-in f32 matmul path: tight check (biases cancel exactly under training BN).
    prep_f32 = prepare_params(params, compute_dtype=jnp.float32)
    out_f32 = jax.block_until_ready(mlp_block(x, prep_f32, out_channels=OUT_CH))
    assert out_f32.shape == (N, OUT_CH)
    assert jnp.allclose(out_f32, ref, atol=1e-3, rtol=1e-3), \
        f"f32 max abs err: {float(jnp.max(jnp.abs(out_f32 - ref)))}"

    # Default bf16 matmul-operand path (native MXU dtype); BN/ReLU math stays f32.
    prep = prepare_params(params)
    out_bf = jax.block_until_ready(mlp_block(x, prep, out_channels=OUT_CH))
    assert out_bf.shape == (N, OUT_CH)
    assert bool(jnp.all(jnp.isfinite(out_bf)))
    rel = jnp.linalg.norm(out_bf - ref) / (jnp.linalg.norm(ref) + 1e-12)
    assert float(rel) < 0.1, f"bf16 rel L2 error too large: {float(rel)}"

    # Row-tiled large-N path, exercised at a small size (grid of 4 row tiles).
    N2 = 256
    x2 = jax.random.normal(k_x2, (N2, IN_CH), jnp.float32)
    ref2 = _reference(x2, params)
    out_t = jax.block_until_ready(
        mlp_block_tiled(x2, prep, out_channels=OUT_CH, row_tile=64))
    assert out_t.shape == (N2, OUT_CH)
    assert bool(jnp.all(jnp.isfinite(out_t)))
    rel_t = jnp.linalg.norm(out_t - ref2) / (jnp.linalg.norm(ref2) + 1e-12)
    assert float(rel_t) < 0.1, f"tiled rel L2 error too large: {float(rel_t)}"

    print("KERNEL_OK")
</pallas_src>

<mosaic_0001>
module attributes {stable_mosaic.version = 11 : i64} {
  func.func @mlp_block_kernel(%arg0: memref<8x16xf32, #tpu.memory_space<vmem>>, %arg1: memref<16x512xf32, #tpu.memory_space<vmem>>, %arg2: memref<512x128xf32, #tpu.memory_space<vmem>>, %arg3: memref<128x128xf32, #tpu.memory_space<vmem>>, %arg4: memref<2x768xf32, #tpu.memory_space<vmem>>, %arg5: memref<8x128xf32, #tpu.memory_space<vmem>>) attributes {dimension_semantics = [], scalar_prefetch = 0 : i64, scratch_operands = 0 : i64, tpu.core_type = #tpu.core_type<tc>} {
    %cst = arith.constant 1.000000e+00 : f32
    %0 = vector.broadcast %cst : f32 to vector<1x8xf32>
    %c0 = arith.constant 0 : index
    %c0_0 = arith.constant 0 : index
    %1 = vector.load %arg4[%c0, %c0_0] : memref<2x768xf32, #tpu.memory_space<vmem>>, vector<2x768xf32>
    %c0_1 = arith.constant 0 : index
    %c0_2 = arith.constant 0 : index
    %2 = vector.load %arg0[%c0_1, %c0_2] : memref<8x16xf32, #tpu.memory_space<vmem>>, vector<8x16xf32>
    %c0_3 = arith.constant 0 : index
    %c0_4 = arith.constant 0 : index
    %3 = vector.load %arg1[%c0_3, %c0_4] : memref<16x512xf32, #tpu.memory_space<vmem>>, vector<16x512xf32>
    %cst_5 = arith.constant dense<0.000000e+00> : vector<8x512xf32>
    %4 = tpu.matmul %2, %3, %cst_5 {dimension_numbers = #tpu.dot_dimension_numbers<[1], [0], [0], [1], [0, 0, 1, 1], [], []>} : vector<8x16xf32>, vector<16x512xf32>, vector<8x512xf32> -> vector<8x512xf32>
    %5 = vector.extract_strided_slice %1 {offsets = [0, 0], sizes = [1, 512], strides = [1, 1]} : vector<2x768xf32> to vector<1x512xf32>
    %6 = vector.extract_strided_slice %1 {offsets = [1, 0], sizes = [1, 512], strides = [1, 1]} : vector<2x768xf32> to vector<1x512xf32>
    %cst_6 = arith.constant dense<0.000000e+00> : vector<1x512xf32>
    %7 = tpu.matmul %0, %4, %cst_6 {dimension_numbers = #tpu.dot_dimension_numbers<[1], [0], [0], [1], [0, 0, 1, 1], [], []>} : vector<1x8xf32>, vector<8x512xf32>, vector<1x512xf32> -> vector<1x512xf32>
    %8 = arith.mulf %4, %4 : vector<8x512xf32>
    %cst_7 = arith.constant dense<0.000000e+00> : vector<1x512xf32>
    %9 = tpu.matmul %0, %8, %cst_7 {dimension_numbers = #tpu.dot_dimension_numbers<[1], [0], [0], [1], [0, 0, 1, 1], [], []>} : vector<1x8xf32>, vector<8x512xf32>, vector<1x512xf32> -> vector<1x512xf32>
    %cst_8 = arith.constant 1.250000e-01 : f32
    %10 = vector.broadcast %cst_8 : f32 to vector<1x512xf32>
    %11 = arith.mulf %7, %10 : vector<1x512xf32>
    %cst_9 = arith.constant 1.250000e-01 : f32
    %12 = vector.broadcast %cst_9 : f32 to vector<1x512xf32>
    %13 = arith.mulf %9, %12 : vector<1x512xf32>
    %14 = arith.mulf %11, %11 : vector<1x512xf32>
    %15 = arith.subf %13, %14 : vector<1x512xf32>
    %cst_10 = arith.constant 0.000000e+00 : f32
    %16 = vector.broadcast %cst_10 : f32 to vector<1x512xf32>
    %17 = arith.maximumf %15, %16 : vector<1x512xf32>
    %cst_11 = arith.constant 9.99999974E-6 : f32
    %18 = vector.broadcast %cst_11 : f32 to vector<1x512xf32>
    %19 = arith.addf %17, %18 : vector<1x512xf32>
    %20 = math.rsqrt %19 : vector<1x512xf32>
    %21 = arith.mulf %5, %20 : vector<1x512xf32>
    %22 = arith.mulf %11, %21 : vector<1x512xf32>
    %23 = arith.subf %6, %22 : vector<1x512xf32>
    %24 = vector.broadcast %21 : vector<1x512xf32> to vector<8x512xf32>
    %25 = arith.mulf %4, %24 : vector<8x512xf32>
    %26 = vector.broadcast %23 : vector<1x512xf32> to vector<8x512xf32>
    %27 = arith.addf %25, %26 : vector<8x512xf32>
    %cst_12 = arith.constant 0.000000e+00 : f32
    %28 = vector.broadcast %cst_12 : f32 to vector<8x512xf32>
    %29 = arith.maximumf %27, %28 : vector<8x512xf32>
    %c0_13 = arith.constant 0 : index
    %c0_14 = arith.constant 0 : index
    %30 = vector.load %arg2[%c0_13, %c0_14] : memref<512x128xf32, #tpu.memory_space<vmem>>, vector<512x128xf32>
    %cst_15 = arith.constant dense<0.000000e+00> : vector<8x128xf32>
    %31 = tpu.matmul %29, %30, %cst_15 {dimension_numbers = #tpu.dot_dimension_numbers<[1], [0], [0], [1], [0, 0, 1, 1], [], []>} : vector<8x512xf32>, vector<512x128xf32>, vector<8x128xf32> -> vector<8x128xf32>
    %32 = vector.extract_strided_slice %1 {offsets = [0, 512], sizes = [1, 128], strides = [1, 1]} : vector<2x768xf32> to vector<1x128xf32>
    %33 = vector.extract_strided_slice %1 {offsets = [1, 512], sizes = [1, 128], strides = [1, 1]} : vector<2x768xf32> to vector<1x128xf32>
    %cst_16 = arith.constant dense<0.000000e+00> : vector<1x128xf32>
    %34 = tpu.matmul %0, %31, %cst_16 {dimension_numbers = #tpu.dot_dimension_numbers<[1], [0], [0], [1], [0, 0, 1, 1], [], []>} : vector<1x8xf32>, vector<8x128xf32>, vector<1x128xf32> -> vector<1x128xf32>
    %35 = arith.mulf %31, %31 : vector<8x128xf32>
    %cst_17 = arith.constant dense<0.000000e+00> : vector<1x128xf32>
    %36 = tpu.matmul %0, %35, %cst_17 {dimension_numbers = #tpu.dot_dimension_numbers<[1], [0], [0], [1], [0, 0, 1, 1], [], []>} : vector<1x8xf32>, vector<8x128xf32>, vector<1x128xf32> -> vector<1x128xf32>
    %cst_18 = arith.constant 1.250000e-01 : f32
    %37 = vector.broadcast %cst_18 : f32 to vector<1x128xf32>
    %38 = arith.mulf %34, %37 : vector<1x128xf32>
    %cst_19 = arith.constant 1.250000e-01 : f32
    %39 = vector.broadcast %cst_19 : f32 to vector<1x128xf32>
    %40 = arith.mulf %36, %39 : vector<1x128xf32>
    %41 = arith.mulf %38, %38 : vector<1x128xf32>
    %42 = arith.subf %40, %41 : vector<1x128xf32>
    %cst_20 = arith.constant 0.000000e+00 : f32
    %43 = vector.broadcast %cst_20 : f32 to vector<1x128xf32>
    %44 = arith.maximumf %42, %43 : vector<1x128xf32>
    %cst_21 = arith.constant 9.99999974E-6 : f32
    %45 = vector.broadcast %cst_21 : f32 to vector<1x128xf32>
    %46 = arith.addf %44, %45 : vector<1x128xf32>
    %47 = math.rsqrt %46 : vector<1x128xf32>
    %48 = arith.mulf %32, %47 : vector<1x128xf32>
    %49 = arith.mulf %38, %48 : vector<1x128xf32>
    %50 = arith.subf %33, %49 : vector<1x128xf32>
    %51 = vector.broadcast %48 : vector<1x128xf32> to vector<8x128xf32>
    %52 = arith.mulf %31, %51 : vector<8x128xf32>
    %53 = vector.broadcast %50 : vector<1x128xf32> to vector<8x128xf32>
    %54 = arith.addf %52, %53 : vector<8x128xf32>
    %cst_22 = arith.constant 0.000000e+00 : f32
    %55 = vector.broadcast %cst_22 : f32 to vector<8x128xf32>
    %56 = arith.maximumf %54, %55 : vector<8x128xf32>
    %c0_23 = arith.constant 0 : index
    %c0_24 = arith.constant 0 : index
    %57 = vector.load %arg3[%c0_23, %c0_24] : memref<128x128xf32, #tpu.memory_space<vmem>>, vector<128x128xf32>
    %cst_25 = arith.constant dense<0.000000e+00> : vector<8x128xf32>
    %58 = tpu.matmul %56, %57, %cst_25 {dimension_numbers = #tpu.dot_dimension_numbers<[1], [0], [0], [1], [0, 0, 1, 1], [], []>} : vector<8x128xf32>, vector<128x128xf32>, vector<8x128xf32> -> vector<8x128xf32>
    %59 = vector.extract_strided_slice %1 {offsets = [0, 640], sizes = [1, 128], strides = [1, 1]} : vector<2x768xf32> to vector<1x128xf32>
    %60 = vector.extract_strided_slice %1 {offsets = [1, 640], sizes = [1, 128], strides = [1, 1]} : vector<2x768xf32> to vector<1x128xf32>
    %cst_26 = arith.constant dense<0.000000e+00> : vector<1x128xf32>
    %61 = tpu.matmul %0, %58, %cst_26 {dimension_numbers = #tpu.dot_dimension_numbers<[1], [0], [0], [1], [0, 0, 1, 1], [], []>} : vector<1x8xf32>, vector<8x128xf32>, vector<1x128xf32> -> vector<1x128xf32>
    %62 = arith.mulf %58, %58 : vector<8x128xf32>
    %cst_27 = arith.constant dense<0.000000e+00> : vector<1x128xf32>
    %63 = tpu.matmul %0, %62, %cst_27 {dimension_numbers = #tpu.dot_dimension_numbers<[1], [0], [0], [1], [0, 0, 1, 1], [], []>} : vector<1x8xf32>, vector<8x128xf32>, vector<1x128xf32> -> vector<1x128xf32>
    %cst_28 = arith.constant 1.250000e-01 : f32
    %64 = vector.broadcast %cst_28 : f32 to vector<1x128xf32>
    %65 = arith.mulf %61, %64 : vector<1x128xf32>
    %cst_29 = arith.constant 1.250000e-01 : f32
    %66 = vector.broadcast %cst_29 : f32 to vector<1x128xf32>
    %67 = arith.mulf %63, %66 : vector<1x128xf32>
    %68 = arith.mulf %65, %65 : vector<1x128xf32>
    %69 = arith.subf %67, %68 : vector<1x128xf32>
    %cst_30 = arith.constant 0.000000e+00 : f32
    %70 = vector.broadcast %cst_30 : f32 to vector<1x128xf32>
    %71 = arith.maximumf %69, %70 : vector<1x128xf32>
    %cst_31 = arith.constant 9.99999974E-6 : f32
    %72 = vector.broadcast %cst_31 : f32 to vector<1x128xf32>
    %73 = arith.addf %71, %72 : vector<1x128xf32>
    %74 = math.rsqrt %73 : vector<1x128xf32>
    %75 = arith.mulf %59, %74 : vector<1x128xf32>
    %76 = arith.mulf %65, %75 : vector<1x128xf32>
    %77 = arith.subf %60, %76 : vector<1x128xf32>
    %78 = vector.broadcast %75 : vector<1x128xf32> to vector<8x128xf32>
    %79 = arith.mulf %58, %78 : vector<8x128xf32>
    %80 = vector.broadcast %77 : vector<1x128xf32> to vector<8x128xf32>
    %81 = arith.addf %79, %80 : vector<8x128xf32>
    %cst_32 = arith.constant 0.000000e+00 : f32
    %82 = vector.broadcast %cst_32 : f32 to vector<8x128xf32>
    %83 = arith.maximumf %81, %82 : vector<8x128xf32>
    %c0_33 = arith.constant 0 : index
    %c0_34 = arith.constant 0 : index
    %84 = vector.load %arg5[%c0_33, %c0_34] : memref<8x128xf32, #tpu.memory_space<vmem>>, vector<8x128xf32>
    tpu.vector_store %arg5[%c0_33, %c0_34], %83 {strides = array<i32>} : memref<8x128xf32, #tpu.memory_space<vmem>>, vector<8x128xf32>,
    return
  }
}

</mosaic_0001>

<bundles_post_ra>
// kernel: mlp_block.1
= control target key start
LH: loop header
LB: loop body
LE: loop exit
PB: predicated region body
PF: predicated region fallthrough
CT: control target
= control target key end

     0   :  { %10 = vsyncpa [#allocation3], 0  ;;  %s1838_s0 = inlined_call_operand.hbm [shape: f32[8,16], index: 0, kind: input, shape index: {}]   ;;  %s1839_s1 = inlined_call_operand.hbm [shape: f32[16,512], index: 1, kind: input, shape index: {}]   ;;  %s1840_s2 = inlined_call_operand.hbm [shape: f32[512,128], index: 2, kind: input, shape index: {}]   ;;  %s1841_s3 = inlined_call_operand.hbm [shape: f32[128,128], index: 3, kind: input, shape index: {}]   ;;  %s1842_s4 = inlined_call_operand.hbm [shape: f32[2,768], index: 4, kind: input, shape index: {}]   ;;  %s1843_s5 = inlined_call_operand.hbm [shape: f32[8,128], index: 5, kind: output, shape index: {}]  }
   0x1   :  { %11 = vsyncpa [#allocation6], 0 }
   0x2   :  { %12 = vsyncpa [#allocation9], 0 }
   0x3   :  { %13 = vsyncpa [#allocation4], 0  ;;  %s1668_s18 = smov [#allocation5]  }
   0x4   :  { %s29_s19 = sshll.u32 %s1668_s18, 4  ;;  %s30_s19 = int_to_ptr.vmem [resolvable:$true] %s29_s19 }
   0x5   :  { %s1548_s20 = scalar_lea.vmem %s30_s19, 1024  ;;  %p1553_p1 = scmp.lt.s32.totalorder %s30_s19, %s30_s19 }
   0x6   :  { %p1549_p0 = scmp.ne.s32.totalorder %s30_s19, %s1548_s20  ;;  %p1554_p2 = scmp.lt.s32.totalorder %s1548_s20, %s1548_s20 }
   0x8   :  { %p1555_p3 = por %p1554_p2, %p1553_p1 }
   0xa   :  { %p1556_p4 = pnand %p1555_p3, %p1549_p0 }
   0xc   :  { %1559 = shalt.err (!%p1556_p4)
}
   0xd   :  { %s1669_s21 = smov 512   ;;  %s1670_s22 = smov 32  }
   0xe   :  { %35 = dma.hbm_to_vmem [thread:$0]  %s1839_s1, 1024, %s30_s19, [#allocation6], %s1669_s21, %s1669_s21, %s1670_s22  }
   0xf   :  { %s1671_s25 = smov [#allocation8]   ;;  %s1672_s27 = smov [#allocation2]  }
  0x10   :  { %s53_s26 = sshll.u32 %s1671_s25, 4  ;;  %s20_s28 = sshll.u32 %s1672_s27, 4  ;;  %s54_s26 = int_to_ptr.vmem [resolvable:$true] %s53_s26  ;;  %s21_s28 = int_to_ptr.vmem [resolvable:$true] %s20_s28 }
  0x11   :  { %s1568_s29 = scalar_lea.vmem %s54_s26, 2048  ;;  %p1573_p6 = scmp.lt.s32.totalorder %s54_s26, %s54_s26 }
  0x12   :  { %p1569_p5 = scmp.ne.s32.totalorder %s54_s26, %s1568_s29  ;;  %p1574_p7 = scmp.lt.s32.totalorder %s1568_s29, %s1568_s29 }
  0x14   :  { %p1575_p8 = por %p1574_p7, %p1573_p6 }
  0x16   :  { %p1576_p9 = pnand %p1575_p8, %p1569_p5 }
  0x18   :  { %1579 = shalt.err (!%p1576_p9)
}
  0x19   :  { %s1673_s30 = smov 128   ;;  %s1674_s6 = smov 8  }
  0x1a   :  { %59 = dma.hbm_to_vmem [thread:$0]  %s1841_s3, 2048, %s54_s26, [#allocation9], %s1673_s30, %s1673_s30, %s1674_s6  }
  0x1b   :  { %s1588_s1 = scalar_lea.vmem %s21_s28, 128  ;;  %p1593_p11 = scmp.lt.s32.totalorder %s21_s28, %s21_s28 }
  0x1c   :  { %p1589_p10 = scmp.ne.s32.totalorder %s21_s28, %s1588_s1  ;;  %p1594_p12 = scmp.lt.s32.totalorder %s1588_s1, %s1588_s1 }
  0x1e   :  { %p1595_p13 = por %p1594_p12, %p1593_p11 }
  0x20   :  { %p1596_p0 = pnand %p1595_p13, %p1589_p10 }
  0x22   :  { %1599 = shalt.err (!%p1596_p0)
}
  0x23   :  { %23 = dma.hbm_to_vmem [thread:$0]  %s1838_s0, 128, %s21_s28, [#allocation3]  }
  0x24   :  { %s1675_s11 = smov [#allocation7]   ;;  %s1676_s13 = smov [#allocation10]  }
  0x25   :  { %s41_s12 = sshll.u32 %s1675_s11, 4  ;;  %s66_s14 = sshll.u32 %s1676_s13, 4  ;;  %s42_s12 = int_to_ptr.vmem [resolvable:$true] %s41_s12  ;;  %s67_s14 = int_to_ptr.vmem [resolvable:$true] %s66_s14 }
  0x26   :  { %s1608_s15 = scalar_lea.vmem %s42_s12, 8192  ;;  %p1613_p2 = scmp.lt.s32.totalorder %s42_s12, %s42_s12 }
  0x27   :  { %p1609_p1 = scmp.ne.s32.totalorder %s42_s12, %s1608_s15  ;;  %p1614_p3 = scmp.lt.s32.totalorder %s1608_s15, %s1608_s15 }
  0x29   :  { %p1615_p4 = por %p1614_p3, %p1613_p2 }
  0x2b   :  { %p1616_p5 = pnand %p1615_p4, %p1609_p1 }
  0x2d   :  { %1619 = shalt.err (!%p1616_p5)
}
  0x2e   :  { %47 = dma.hbm_to_vmem [thread:$0]  %s1840_s2, 8192, %s42_s12, [#allocation6], %s1673_s30, %s1673_s30, %s1674_s6  }
  0x2f   :  { %s1628_s17 = scalar_lea.vmem %s67_s14, 192  ;;  %p1633_p7 = scmp.lt.s32.totalorder %s67_s14, %s67_s14 }
  0x30   :  { %p1629_p6 = scmp.ne.s32.totalorder %s67_s14, %s1628_s17  ;;  %p1634_p8 = scmp.lt.s32.totalorder %s1628_s17, %s1628_s17 }
  0x32   :  { %p1635_p9 = por %p1634_p8, %p1633_p7 }
  0x34   :  { %p1636_p10 = pnand %p1635_p9, %p1629_p6 }
  0x36   :  { %1639 = shalt.err (!%p1636_p10)
}
  0x37   :  { %69 = dma.hbm_to_vmem [thread:$0]  %s1842_s4, 192, %s67_s14, [#allocation9]  }
  0x38   :  { %1660 = dma.done.wait [#allocation3], 128  }
  0x39   :  { %1661 = vsyncadd [#allocation3], 4294967168 }
  0x3a   :  { %1662 = dma.done.wait [#allocation6], 9216  }
  0x3b   :  { %1663 = vsyncadd [#allocation6], 4294958080 }
  0x3c   :  { %1664 = dma.done.wait [#allocation9], 2240  }
  0x3d   :  { %1665 = vsyncadd [#allocation9], 4294965056  ;;  %v1677_v0 = vmov 0.0   ;;  %v93_v1 = vld [vmem:[#allocation5 + $0x28] sm:$0xff]  ;;  %v92_v2 = vld [vmem:[#allocation5 + $0x20] sm:$0xff]  ;;  %vm96_vm0 = vcmask 130048  }
  0x3e   :  { %164 = vmatprep.mubr.f32.mxu1 %v1677_v0  ;;  %v89_v3 = vld [vmem:[#allocation5 + $0x8] sm:$0xff]  ;;  %128 = vmatprep.subr.mxu1 %v93_v1  ;;  %v88_v4 = vld [vmem:[#allocation5] sm:$0xff]  ;;  %v87_v5 = vld [vmem:[#allocation2] sm:$0xff]  ;;  %vm242_vm1 = vcmask 64512   ;;  %v1678_v13 = vmov 1.0   ;;  %vm1680_vm2 = vmmov 0  }
  0x3f   :  { %129 = vmatpush1.msra.mxu1 %v92_v2  ;;  %v95_v6 = vld [vmem:[#allocation5 + $0x38] sm:$0xff]  ;;  %v94_v7 = vld [vmem:[#allocation5 + $0x30] sm:$0xff]  ;;  %v728_v27 = vld [vmem:[#allocation7 + $0xe8] sm:$0xff]  ;;  %s1681_s2 = smov [#allocation11]  }
  0x40   :  { %130 = vmatprep.subr.mxu1 %v89_v3  ;;  %v91_v8 = vld [vmem:[#allocation5 + $0x18] sm:$0xff]  ;;  %v90_v9 = vld [vmem:[#allocation5 + $0x10] sm:$0xff]  ;;  %v760_v28 = vld [vmem:[#allocation7 + $0x1e8] sm:$0xff]  ;;  %s1343_s4 = sshll.u32 %s1681_s2, 4  ;;  %s1344_s4 = int_to_ptr.vmem [resolvable:$true] %s1343_s4 }
  0x41   :  { %131 = vmatpush1.msra.mxu1 %v88_v4  ;;  %v730_v19 = vld [vmem:[#allocation7 + $0xf8] sm:$0xff]  ;;  %v729_v23 = vld [vmem:[#allocation7 + $0xf0] sm:$0xff]  ;;  %v712_v29 = vld [vmem:[#allocation7 + $0x68] sm:$0xff]  ;;  %s1640_s19 = scalar_lea.vmem %s1344_s4, 128  ;;  %p1645_p12 = scmp.lt.s32.totalorder %s1344_s4, %s1344_s4 }
  0x42   :  { %1354 = vmatmul.mubr.msk.f32.vlgmr.msra.gmra.mxu1 %vm96_vm0, %v87_v5  ;;  %199 = vmatprep.subr.mxu1 %v95_v6  ;;  %v762_v20 = vld [vmem:[#allocation7 + $0x1f8] sm:$0xff]  ;;  %v761_v24 = vld [vmem:[#allocation7 + $0x1f0] sm:$0xff]  ;;  %v744_v30 = vld [vmem:[#allocation7 + $0x168] sm:$0xff]  ;;  %p1641_p11 = scmp.ne.s32.totalorder %s1344_s4, %s1640_s19  ;;  %p1646_p13 = scmp.lt.s32.totalorder %s1640_s19, %s1640_s19 }
  0x43   :  { %200 = vmatpush1.msra.mxu1 %v94_v7  ;;  %235 = vmatprep.mubr.f32.mxu1 %v1677_v0  ;;  %v714_v21 = vld [vmem:[#allocation7 + $0x78] sm:$0xff]  ;;  %v713_v25 = vld [vmem:[#allocation7 + $0x70] sm:$0xff]  ;;  %v727_v31 = vld [vmem:[#allocation7 + $0xe0] sm:$0xff] }
  0x44   :  { %201 = vmatprep.subr.mxu1 %v91_v8  ;;  %1364 = vmatprep.subr.mxu0 %v730_v19  ;;  %v746_v22 = vld [vmem:[#allocation7 + $0x178] sm:$0xff]  ;;  %v745_v26 = vld [vmem:[#allocation7 + $0x170] sm:$0xff]  ;;  %v759_v32 = vld [vmem:[#allocation7 + $0x1e0] sm:$0xff]  ;;  %p1647_p0 = por %p1646_p13, %p1645_p12 }
  0x45   :  { %202 = vmatpush1.msra.mxu1 %v90_v9  ;;  %1365 = vmatpush3.msra.mxu0 %v714_v21  ;;  %v711_v33 = vld [vmem:[#allocation7 + $0x60] sm:$0xff]  ;;  %v726_v35 = vld [vmem:[#allocation7 + $0xd8] sm:$0xff]  ;;  %v725_v39 = vld [vmem:[#allocation7 + $0xd0] sm:$0xff] }
  0x46   :  { %1355 = vmatmul.mubr.msk.f32.vlgmr.msra.gmra.mxu1 %vm96_vm0, %v87_v5  ;;  %1366 = vmatprep.subr.mxu0 %v729_v23  ;;  %v743_v34 = vld [vmem:[#allocation7 + $0x160] sm:$0xff]  ;;  %v758_v36 = vld [vmem:[#allocation7 + $0x1d8] sm:$0xff]  ;;  %v757_v40 = vld [vmem:[#allocation7 + $0x1d0] sm:$0xff]  ;;  %p1648_p1 = pnand %p1647_p0, %p1641_p11 }
  0x47   :  { %310 = vmatprep.mubr.f32.mxu1 %v1677_v0  ;;  %1367 = vmatpush3.msra.mxu0 %v713_v25  ;;  %v710_v37 = vld [vmem:[#allocation7 + $0x58] sm:$0xff]  ;;  %v709_v41 = vld [vmem:[#allocation7 + $0x50] sm:$0xff]  ;;  %v724_v43 = vld [vmem:[#allocation7 + $0xc8] sm:$0xff] }
  0x48   :  { %1368 = vmatprep.subr.mxu0 %v728_v27  ;;  %v742_v38 = vld [vmem:[#allocation7 + $0x158] sm:$0xff]  ;;  %v741_v42 = vld [vmem:[#allocation7 + $0x150] sm:$0xff]  ;;  %v756_v44 = vld [vmem:[#allocation7 + $0x1c8] sm:$0xff] }
  0x49   :  { %1369 = vmatpush3.msra.mxu0 %v712_v29  ;;  %v708_v45 = vld [vmem:[#allocation7 + $0x48] sm:$0xff]  ;;  %v723_v47 = vld [vmem:[#allocation7 + $0xc0] sm:$0xff]  ;;  %v722_v51 = vld [vmem:[#allocation7 + $0xb8] sm:$0xff] }
  0x4a   :  { %1370 = vmatprep.subr.mxu0 %v727_v31  ;;  %v740_v46 = vld [vmem:[#allocation7 + $0x148] sm:$0xff]  ;;  %v755_v48 = vld [vmem:[#allocation7 + $0x1c0] sm:$0xff]  ;;  %v754_v52 = vld [vmem:[#allocation7 + $0x1b8] sm:$0xff] }
  0x4b   :  { %1371 = vmatpush3.msra.mxu0 %v711_v33  ;;  %v707_v49 = vld [vmem:[#allocation7 + $0x40] sm:$0xff]  ;;  %v706_v53 = vld [vmem:[#allocation7 + $0x38] sm:$0xff]  ;;  %v721_v55 = vld [vmem:[#allocation7 + $0xb0] sm:$0xff] }
  0x4c   :  { %1372 = vmatprep.subr.mxu0 %v726_v35  ;;  %v739_v50 = vld [vmem:[#allocation7 + $0x140] sm:$0xff]  ;;  %v738_v54 = vld [vmem:[#allocation7 + $0x138] sm:$0xff]  ;;  %v753_v56 = vld [vmem:[#allocation7 + $0x1b0] sm:$0xff] }
  0x4d   :  { %1373 = vmatpush3.msra.mxu0 %v710_v37  ;;  %v705_v57 = vld [vmem:[#allocation7 + $0x30] sm:$0xff]  ;;  %v720_v59 = vld [vmem:[#allocation7 + $0xa8] sm:$0xff]  ;;  %v719_v63 = vld [vmem:[#allocation7 + $0xa0] sm:$0xff] }
  0x4e   :  { %1374 = vmatprep.subr.mxu0 %v725_v39  ;;  %v737_v58 = vld [vmem:[#allocation7 + $0x130] sm:$0xff]  ;;  %v752_v60 = vld [vmem:[#allocation7 + $0x1a8] sm:$0xff]  ;;  %v751_v1 = vld [vmem:[#allocation7 + $0x1a0] sm:$0xff] }
  0x4f   :  { %1375 = vmatpush3.msra.mxu0 %v709_v41  ;;  %v704_v61 = vld [vmem:[#allocation7 + $0x28] sm:$0xff]  ;;  %v703_v2 = vld [vmem:[#allocation7 + $0x20] sm:$0xff]  ;;  %v718_v4 = vld [vmem:[#allocation7 + $0x98] sm:$0xff] }
  0x50   :  { %1376 = vmatprep.subr.mxu0 %v724_v43  ;;  %v736_v62 = vld [vmem:[#allocation7 + $0x128] sm:$0xff]  ;;  %v735_v3 = vld [vmem:[#allocation7 + $0x120] sm:$0xff]  ;;  %v750_v5 = vld [vmem:[#allocation7 + $0x198] sm:$0xff] }
  0x51   :  { %1377 = vmatpush3.msra.mxu0 %v708_v45  ;;  %v702_v6 = vld [vmem:[#allocation7 + $0x18] sm:$0xff]  ;;  %v717_v8 = vld [vmem:[#allocation7 + $0x90] sm:$0xff]  ;;  %v700_v19 = vld [vmem:[#allocation7 + $0x8] sm:$0xff] }
  0x52   :  { %1378 = vmatprep.subr.mxu0 %v723_v47  ;;  %v734_v7 = vld [vmem:[#allocation7 + $0x118] sm:$0xff]  ;;  %v749_v9 = vld [vmem:[#allocation7 + $0x190] sm:$0xff]  ;;  %v715_v21 = vld [vmem:[#allocation7 + $0x80] sm:$0xff] }
  0x53   :  { %1379 = vmatpush3.msra.mxu0 %v707_v49  ;;  %v699_v23 = vld [vmem:[#allocation7] sm:$0xff] }
  0x54   :  { %1380 = vmatprep.subr.mxu0 %v722_v51 }
  0x55   :  { %1381 = vmatpush3.msra.mxu0 %v706_v53 }
  0x56   :  { %1382 = vmatprep.subr.mxu0 %v721_v55 }
  0x57   :  { %1383 = vmatpush3.msra.mxu0 %v705_v57  ;;  %v1679_v57 = vmov 1983009808  }
  0x58   :  { %1384 = vmatprep.subr.mxu0 %v720_v59  ;;  %v571_v59 = vlaneseq }
  0x59   :  { %1385 = vmatpush3.msra.mxu0 %v704_v61 }
  0x5a   :  { %1386 = vmatprep.subr.mxu0 %v719_v63  ;;  %v572_v61 = vshrl.u32 %v571_v59, 7 }
  0x5b   :  { %1387 = vmatpush3.msra.mxu0 %v703_v2 }
  0x5c   :  { %1388 = vmatprep.subr.mxu0 %v718_v4 }
  0x5d   :  { %1389 = vmatpush3.msra.mxu0 %v702_v6 }
  0x5e   :  { %1390 = vmatprep.subr.mxu0 %v717_v8  ;;  %v85_v8 = vld [vmem:[#allocation10] sm:$0xff] }
 0x102   :  { %v1730_v10 = vpop.f32.mrf.mxu1 }
 0x103   :  { %v388_v16 = vmul.f32 %v1730_v10, %v1730_v10 }
 0x104   :  { %v1732_v11 = vpop.f32.mrf.mxu1 }
 0x105   :  { %276 = vmatprep.subr.mxu1 %v1732_v11  ;;  %v389_v15 = vmul.f32 %v1732_v11, %v1732_v11 }
 0x106   :  { %v1735_v12 = vpop.f32.mrf.mxu1  ;;  %277 = vmatpush1.msra.mxu1 %v1730_v10 }
 0x107   :  { %1356 = vmatmul.mubr.msk.f32.vlgmr.msra.gmra.mxu1 %vm242_vm1, %v1678_v13  ;;  %v390_v18 = vmul.f32 %v1735_v12, %v1735_v12 }
 0x108   :  { %v1740_v14 = vpop.f32.mrf.mxu1  ;;  %381 = vmatprep.mubr.f32.mxu1 %v1677_v0 }
 0x109   :  { %347 = vmatprep.subr.mxu1 %v1740_v14  ;;  %v391_v17 = vmul.f32 %v1740_v14, %v1740_v14 }
 0x10a   :  { %348 = vmatpush1.msra.mxu1 %v1735_v12 }
 0x10b   :  { %1357 = vmatmul.mubr.msk.f32.vlgmr.msra.gmra.mxu1 %vm242_vm1, %v1678_v13  ;;  %422 = vmatprep.subr.mxu1 %v389_v15  ;;  %v701_v15 = vld [vmem:[#allocation7 + $0x10] sm:$0xff] }
 0x10c   :  { %423 = vmatpush1.msra.mxu1 %v388_v16  ;;  %456 = vmatprep.mubr.f32.mxu1 %v1677_v0  ;;  %v733_v16 = vld [vmem:[#allocation7 + $0x110] sm:$0xff] }
 0x10d   :  { %493 = vmatprep.subr.mxu1 %v391_v17  ;;  %v716_v17 = vld [vmem:[#allocation7 + $0x88] sm:$0xff]  ;;  %1391 = vmatpush3.msra.mxu0 %v701_v15 }
 0x10e   :  { %1392 = vmatprep.subr.mxu0 %v716_v17  ;;  %v596_v17 = vsub.s32 4, %v572_v61 }
 0x10f   :  { %1358 = vmatmul.mubr.msk.f32.vlgmr.msra.gmra.mxu1 %vm242_vm1, %v1678_v13  ;;  %1393 = vmatpush3.msra.mxu0 %v700_v19 }
 0x110   :  { %494 = vmatpush1.msra.mxu1 %v390_v18  ;;  %527 = vmatprep.mubr.f32.mxu1 %v1677_v0  ;;  %v748_v18 = vld [vmem:[#allocation7 + $0x188] sm:$0xff] }
 0x111   :  { %1399 = vmatprep.subr.mxu1 %v762_v20  ;;  %v732_v20 = vld [vmem:[#allocation7 + $0x108] sm:$0xff]  ;;  %1394 = vmatprep.subr.mxu0 %v715_v21 }
 0x112   :  { %1395 = vmatpush3.msra.mxu0 %v699_v23 }
 0x113   :  { %1359 = vmatmul.mubr.msk.f32.vlgmr.msra.gmra.mxu1 %vm242_vm1, %v1678_v13  ;;  %1459 = vmatprep.subr.mxu0 %v1677_v0 }
 0x114   :  { %1400 = vmatpush3.msra.mxu1 %v746_v22  ;;  %v747_v22 = vld [vmem:[#allocation7 + $0x180] sm:$0xff] }
 0x115   :  { %1401 = vmatprep.subr.mxu1 %v761_v24  ;;  %v731_v24 = vld [vmem:[#allocation7 + $0x100] sm:$0xff] }
 0x116   :  { %1402 = vmatpush3.msra.mxu1 %v745_v26 }
 0x117   :  { %1403 = vmatprep.subr.mxu1 %v760_v28 }
 0x118   :  { %1404 = vmatpush3.msra.mxu1 %v744_v30 }
 0x119   :  { %1405 = vmatprep.subr.mxu1 %v759_v32 }
 0x11a   :  { %1406 = vmatpush3.msra.mxu1 %v743_v34 }
 0x11b   :  { %1407 = vmatprep.subr.mxu1 %v758_v36 }
 0x11c   :  { %1408 = vmatpush3.msra.mxu1 %v742_v38 }
 0x11d   :  { %1409 = vmatprep.subr.mxu1 %v757_v40 }
 0x11e   :  { %1410 = vmatpush3.msra.mxu1 %v741_v42 }
 0x11f   :  { %1411 = vmatprep.subr.mxu1 %v756_v44 }
 0x120   :  { %1412 = vmatpush3.msra.mxu1 %v740_v46 }
 0x121   :  { %1413 = vmatprep.subr.mxu1 %v755_v48 }
 0x122   :  { %1414 = vmatpush3.msra.mxu1 %v739_v50 }
 0x123   :  { %1415 = vmatprep.subr.mxu1 %v754_v52 }
 0x124   :  { %1416 = vmatpush3.msra.mxu1 %v738_v54 }
 0x125   :  { %1417 = vmatprep.subr.mxu1 %v753_v56 }
 0x126   :  { %1418 = vmatpush3.msra.mxu1 %v737_v58  ;;  %v569_v58 = vunpack.c.l.s4 %v1679_v57 }
 0x127   :  { %1419 = vmatprep.subr.mxu1 %v752_v60 }
 0x128   :  { %1420 = vmatpush3.msra.mxu1 %v736_v62  ;;  %v570_v60 = vunpack.c.0.s8 %v569_v58 }
 0x129   :  { %1421 = vmatprep.subr.mxu1 %v751_v1 }
 0x12a   :  { %1422 = vmatpush3.msra.mxu1 %v735_v3  ;;  %v1763_v3 = vsub.s32 %v570_v60, %v572_v61 }
 0x12b   :  { %1423 = vmatprep.subr.mxu1 %v750_v5 }
 0x12c   :  { %1424 = vmatpush3.msra.mxu1 %v734_v7 }
 0x12d   :  { %1425 = vmatprep.subr.mxu1 %v749_v9  ;;  %v1767_v9 = vsub.s32 0, %v572_v61 }
 0x12e   :  { %1426 = vmatpush3.msra.mxu1 %v733_v16  ;;  %v592_v16 = vsub.s32 2, %v572_v61 }
 0x12f   :  { %1427 = vmatprep.subr.mxu1 %v748_v18  ;;  %v600_v18 = vsub.s32 6, %v572_v61 }
 0x130   :  { %1428 = vmatpush3.msra.mxu1 %v732_v20 }
 0x131   :  { %1429 = vmatprep.subr.mxu1 %v747_v22 }
 0x132   :  { %1430 = vmatpush3.msra.mxu1 %v731_v24 }
 0x133   :  { %1464 = vmatprep.subr.mxu1 %v1677_v0 }
 0x1c7   :  { %v312_v25 = vpop.f32.mrf.mxu1 }
 0x1c8   :  { %v534_v28 = vmul.f32 0.125, %v312_v25 }
 0x1c9   :  { %v314_v26 = vpop.f32.mrf.mxu1 }
 0x1ca   :  { %v535_v30 = vmul.f32 0.125, %v314_v26  ;;  %v542_v32 = vmul.f32 %v534_v28, %v534_v28 }
 0x1cb   :  { %v383_v27 = vpop.f32.mrf.mxu1 }
 0x1cc   :  { %v536_v33 = vmul.f32 0.125, %v383_v27  ;;  %v543_v36 = vmul.f32 %v535_v30, %v535_v30 }
 0x1cd   :  { %v385_v29 = vpop.f32.mrf.mxu1 }
 0x1ce   :  { %v537_v37 = vmul.f32 0.125, %v385_v29  ;;  %v544_v41 = vmul.f32 %v536_v33, %v536_v33 }
 0x1cf   :  { %v458_v31 = vpop.f32.mrf.mxu1 }
 0x1d0   :  { %v538_v34 = vmul.f32 0.125, %v458_v31  ;;  %v545_v46 = vmul.f32 %v537_v37, %v537_v37 }
 0x1d1   :  { %v460_v35 = vpop.f32.mrf.mxu1 }
 0x1d2   :  { %v546_v38 = vsub.f32 %v538_v34, %v542_v32  ;;  %v539_v39 = vmul.f32 0.125, %v460_v35 }
 0x1d3   :  { %v529_v40 = vpop.f32.mrf.mxu1 }
 0x1d4   :  { %v550_v42 = vmax.f32 %v546_v38, 0.0  ;;  %v547_v43 = vsub.f32 %v539_v39, %v543_v36  ;;  %v540_v44 = vmul.f32 0.125, %v529_v40  ;;  %v1772_v36 = vsub.s32 1, %v572_v61 }
 0x1d5   :  { %v531_v45 = vpop.f32.mrf.mxu1  ;;  %v661_v39 = vsub.s32 3, %v572_v61  ;;  %v669_v40 = vsub.s32 7, %v572_v61 }
 0x1d6   :  { %v551_v47 = vmax.f32 %v547_v43, 0.0  ;;  %v548_v48 = vsub.f32 %v540_v44, %v544_v41  ;;  %v541_v49 = vmul.f32 0.125, %v531_v45  ;;  %v554_v50 = vadd.f32 1e-05, %v550_v42 }
 0x1d7   :  { %v665_v41 = vsub.s32 5, %v572_v61 }
 0x1d8   :  { %v555_v51 = vadd.f32 1e-05, %v551_v47  ;;  %v552_v52 = vmax.f32 %v548_v48, 0.0  ;;  %v549_v53 = vsub.f32 %v541_v49, %v545_v46 }
 0x1da   :  { %1528 = vrsqrt.f32 %v555_v51  ;;  %v556_v54 = vadd.f32 1e-05, %v552_v52  ;;  %v553_v55 = vmax.f32 %v549_v53, 0.0 }
 0x1db   :  { %1530 = vrsqrt.f32 %v554_v50 }
 0x1dc   :  { %v557_v56 = vadd.f32 1e-05, %v553_v55  ;;  %1532 = vrsqrt.f32 %v556_v54 }
 0x1de   :  { %1534 = vrsqrt.f32 %v557_v56 }
 0x1e7   :  { %v1529_v62 = vpop.eup %1528 }
 0x1e8   :  { %v1531_v63 = vpop.eup %1530 }
 0x1e9   :  { %v1533_v1 = vpop.eup %1532  ;;  %v566_v2 = vcombine.low %v1531_v63, %v1529_v62 }
 0x1eb   :  { %v1535_v4 = vpop.eup %1534  ;;  %v574_v6 = vrot.slane %v566_v2, %v1763_v3 }
 0x1ec   :  { %v567_v5 = vcombine.low %v1533_v1, %v1535_v4 }
 0x1ee   :  { %v581_v7 = vrot.slane %v567_v5, %v1763_v3  ;;  %v1090_v5 = vld [vmem:[#allocation8 + $0x78] sm:$0xff] }
 0x1f0   :  { %v582_v15 = vcombine.low %v574_v6, %v581_v7  ;;  %v1089_v6 = vld [vmem:[#allocation8 + $0x70] sm:$0xff]  ;;  %v1088_v7 = vld [vmem:[#allocation8 + $0x68] sm:$0xff] }
 0x1f2   :  { %v584_v19 = vmul.f32 %v582_v15, %v85_v8  ;;  %v1086_v15 = vld [vmem:[#allocation8 + $0x58] sm:$0xff] }
 0x1f4   :  { %v589_v20 = vrot.slane %v584_v19, %v1767_v9  ;;  %v593_v21 = vrot.slane %v584_v19, %v592_v16  ;;  %v597_v22 = vrot.slane %v584_v19, %v596_v17  ;;  %v601_v23 = vrot.slane %v584_v19, %v600_v18  ;;  %v1085_v16 = vld [vmem:[#allocation8 + $0x50] sm:$0xff]  ;;  %v1084_v17 = vld [vmem:[#allocation8 + $0x48] sm:$0xff]  ;;  %v1083_v18 = vld [vmem:[#allocation8 + $0x40] sm:$0xff] }
 0x1f5   :  { %v1082_v19 = vld [vmem:[#allocation8 + $0x38] sm:$0xff] }
 0x1f6   :  { %v606_v24 = vmul.f32 %v589_v20, %v534_v28  ;;  %v607_v25 = vmul.f32 %v593_v21, %v535_v30  ;;  %v608_v26 = vmul.f32 %v597_v22, %v536_v33  ;;  %v609_v27 = vmul.f32 %v601_v23, %v537_v37 }
 0x1f7   :  { %v641_v42 = vrot.slane %v593_v21, %v1767_v9  ;;  %v649_v28 = vrot.slane %v601_v23, %v1767_v9  ;;  %v637_v30 = vrot.slane %v589_v20, %v1767_v9  ;;  %v645_v33 = vrot.slane %v597_v22, %v1767_v9  ;;  %v1081_v20 = vld [vmem:[#allocation8 + $0x30] sm:$0xff]  ;;  %v1080_v21 = vld [vmem:[#allocation8 + $0x28] sm:$0xff]  ;;  %v1079_v22 = vld [vmem:[#allocation8 + $0x20] sm:$0xff] }
 0x1f8   :  { %v614_v29 = vcombine.low %v606_v24, %v607_v25  ;;  %v615_v31 = vcombine.low %v608_v26, %v609_v27  ;;  %v1078_v23 = vld [vmem:[#allocation8 + $0x18] sm:$0xff]  ;;  %v1077_v24 = vld [vmem:[#allocation8 + $0x10] sm:$0xff]  ;;  %v1076_v25 = vld [vmem:[#allocation8 + $0x8] sm:$0xff] }
 0x1f9   :  { %v651_v47 = vmul.f32 %v641_v42, %v1732_v11  ;;  %v653_v48 = vmul.f32 %v649_v28, %v1740_v14  ;;  %v650_v49 = vmul.f32 %v637_v30, %v1730_v10  ;;  %v652_v50 = vmul.f32 %v645_v33, %v1735_v12  ;;  %v1075_v26 = vld [vmem:[#allocation8] sm:$0xff]  ;;  %v86_v42 = vld [vmem:[#allocation10 + $0x8] sm:$0xf] }
 0x1fa   :  { %v622_v32 = vrot.slane %v614_v29, %v1763_v3  ;;  %v629_v34 = vrot.slane %v615_v31, %v1763_v3 }
 0x1fc   :  { %v630_v35 = vcombine.low %v622_v32, %v629_v34 }
 0x1fe   :  { %v631_v38 = vrot.slane %v630_v35, 7 }
 0x200   :  { %v633_v37 = vsub.f32 %v85_v8, %v631_v38  ;;  %v1087_v8 = vld [vmem:[#allocation8 + $0x60] sm:$0xff] }
 0x202   :  { %v662_v43 = vrot.slane %v633_v37, %v661_v39  ;;  %v670_v44 = vrot.slane %v633_v37, %v669_v40  ;;  %v658_v45 = vrot.slane %v633_v37, %v1772_v36  ;;  %v666_v46 = vrot.slane %v633_v37, %v665_v41 }
 0x204   :  { %v682_v51 = vrot.slane %v662_v43, %v1772_v36  ;;  %v690_v52 = vrot.slane %v670_v44, %v1772_v36  ;;  %v678_v53 = vrot.slane %v658_v45, %v1772_v36  ;;  %v686_v54 = vrot.slane %v666_v46, %v1772_v36 }
 0x206   :  { %v692_v55 = vadd.f32 %v682_v51, %v651_v47  ;;  %v694_v56 = vadd.f32 %v690_v52, %v653_v48  ;;  %v691_v57 = vadd.f32 %v678_v53, %v650_v49  ;;  %v693_v58 = vadd.f32 %v686_v54, %v652_v50 }
 0x208   :  { %v696_v59 = vmax.f32 %v692_v55, 0.0  ;;  %v698_v11 = vmax.f32 %v694_v56, 0.0  ;;  %v695_v60 = vmax.f32 %v691_v57, 0.0  ;;  %v697_v14 = vmax.f32 %v693_v58, 0.0 }
 0x20a   :  { %827 = vmatprep.mubr.f32.mxu0 %v696_v59  ;;  %897 = vmatprep.mubr.f32.mxu1 %v698_v11 }
 0x20b   :  { %828 = vmatmul.mubr.f32.vlgmr.msra.gmra.mxu0 %v695_v60  ;;  %898 = vmatmul.mubr.f32.vlgmr.msra.gmra.mxu1 %v697_v14 }
 0x20c   :  { %1461 = vmatprep.mubr.msk.f32.mxu0 %vm1680_vm2, %v1677_v0  ;;  %1466 = vmatprep.mubr.msk.f32.mxu1 %vm1680_vm2, %v1677_v0 }
 0x2cb   :  { %v1396_v10 = vpop.f32.mrf.mxu0  ;;  %v1431_v12 = vpop.f32.mrf.mxu1 }
 0x2cd   :  { %v1397_v61 = vpop.f32.mrf.mxu0  ;;  %v1432_v62 = vpop.f32.mrf.mxu1 }
 0x2ce   :  { %v1398_v63 = vadd.f32 %v1397_v61, %v1396_v10  ;;  %v1433_v1 = vadd.f32 %v1432_v62, %v1431_v12  ;;  %v1310_v10 = vrot.slane %v86_v42, 2 }
 0x2d0   :  { %v1791_v2 = vadd.f32 %v1433_v1, %v1398_v63 }
 0x2d2   :  { %v973_v4 = vmul.f32 %v1791_v2, %v1791_v2  ;;  %1460 = vmatpush3.msra.mxu0 %v1791_v2 }
 0x2d3   :  { %1462 = vmatmul.mubr.msk.f32.vlgmr.msra.gmra.mxu0 %vm242_vm1, %v1678_v13  ;;  %1469 = vmatprep.subr.mxu0 %v1677_v0 }
 0x2d4   :  { %1465 = vmatpush3.msra.mxu1 %v973_v4  ;;  %1501 = vmatprep.mubr.msk.f32.mxu0 %vm1680_vm2, %v1677_v0 }
 0x2d5   :  { %1467 = vmatmul.mubr.msk.f32.vlgmr.msra.gmra.mxu1 %vm242_vm1, %v1678_v13  ;;  %1504 = vmatprep.subr.mxu1 %v1677_v0 }
 0x2d6   :  { %1506 = vmatprep.mubr.msk.f32.mxu1 %vm1680_vm2, %v1677_v0  ;;  %1470 = vmatpush3.msra.mxu0 %v1090_v5 }
 0x2d7   :  { %1471 = vmatprep.subr.mxu0 %v1677_v0 }
 0x2d8   :  { %1472 = vmatpush3.msra.mxu0 %v1089_v6 }
 0x2d9   :  { %1473 = vmatprep.subr.mxu0 %v1677_v0 }
 0x2da   :  { %1474 = vmatpush3.msra.mxu0 %v1088_v7 }
 0x2db   :  { %1475 = vmatprep.subr.mxu0 %v1677_v0 }
 0x2dc   :  { %1476 = vmatpush3.msra.mxu0 %v1087_v8 }
 0x2dd   :  { %1477 = vmatprep.subr.mxu0 %v1677_v0 }
 0x2de   :  { %1478 = vmatpush3.msra.mxu0 %v1086_v15 }
 0x2df   :  { %1479 = vmatprep.subr.mxu0 %v1677_v0 }
 0x2e0   :  { %1480 = vmatpush3.msra.mxu0 %v1085_v16 }
 0x2e1   :  { %1481 = vmatprep.subr.mxu0 %v1677_v0 }
 0x2e2   :  { %1482 = vmatpush3.msra.mxu0 %v1084_v17 }
 0x2e3   :  { %1483 = vmatprep.subr.mxu0 %v1677_v0 }
 0x2e4   :  { %1484 = vmatpush3.msra.mxu0 %v1083_v18 }
 0x2e5   :  { %1485 = vmatprep.subr.mxu0 %v1677_v0 }
 0x2e6   :  { %1486 = vmatpush3.msra.mxu0 %v1082_v19 }
 0x2e7   :  { %1487 = vmatprep.subr.mxu0 %v1677_v0 }
 0x2e8   :  { %1488 = vmatpush3.msra.mxu0 %v1081_v20 }
 0x2e9   :  { %1489 = vmatprep.subr.mxu0 %v1677_v0 }
 0x2ea   :  { %1490 = vmatpush3.msra.mxu0 %v1080_v21 }
 0x2eb   :  { %1491 = vmatprep.subr.mxu0 %v1677_v0 }
 0x2ec   :  { %1492 = vmatpush3.msra.mxu0 %v1079_v22 }
 0x2ed   :  { %1493 = vmatprep.subr.mxu0 %v1677_v0 }
 0x2ee   :  { %1494 = vmatpush3.msra.mxu0 %v1078_v23 }
 0x2ef   :  { %1495 = vmatprep.subr.mxu0 %v1677_v0 }
 0x2f0   :  { %1496 = vmatpush3.msra.mxu0 %v1077_v24 }
 0x2f1   :  { %1497 = vmatprep.subr.mxu0 %v1677_v0 }
 0x2f2   :  { %1498 = vmatpush3.msra.mxu0 %v1076_v25 }
 0x2f3   :  { %1499 = vmatprep.subr.mxu0 %v1677_v0 }
 0x2f4   :  { %1500 = vmatpush3.msra.mxu0 %v1075_v26 }
 0x393   :  { %v969_v27 = vpop.f32.mrf.mxu0 }
 0x394   :  { %v1044_v29 = vmul.f32 0.125, %v969_v27 }
 0x395   :  { %v1463_v31 = vpop.f32.mrf.mxu0  ;;  %v1040_v32 = vpop.f32.mrf.mxu1 }
 0x396   :  { %v1046_v34 = vmul.f32 %v1044_v29, %v1044_v29  ;;  %v1045_v35 = vmul.f32 0.125, %v1040_v32 }
 0x397   :  { %v1468_v38 = vpop.f32.mrf.mxu1 }
 0x398   :  { %v1047_v39 = vsub.f32 %v1045_v35, %v1046_v34 }
 0x39a   :  { %v1048_v40 = vmax.f32 %v1047_v39, 0.0 }
 0x39c   :  { %v1049_v41 = vadd.f32 1e-05, %v1048_v40 }
 0x39e   :  { %1536 = vrsqrt.f32 %v1049_v41 }
 0x3ab   :  { %v1537_v28 = vpop.eup %1536 }
 0x3ac   :  { %v1051_v30 = vmul.f32 %v1537_v28, %v86_v42 }
 0x3ae   :  { %v1052_v33 = vmul.f32 %v1051_v30, %v1044_v29  ;;  %v1067_v44 = vrot.slane %v1051_v30, %v1767_v9 }
 0x3b0   :  { %v1060_v37 = vrot.slane %v1052_v33, %v1763_v3  ;;  %v1068_v46 = vmul.f32 %v1067_v44, %v1791_v2 }
 0x3b2   :  { %v1061_v43 = vrot.slane %v1060_v37, 7 }
 0x3b4   :  { %v1063_v45 = vsub.f32 %v86_v42, %v1061_v43 }
 0x3b6   :  { %v1072_v47 = vrot.slane %v1063_v45, %v1772_v36 }
 0x3b8   :  { %v1073_v48 = vadd.f32 %v1072_v47, %v1068_v46 }
 0x3ba   :  { %v1074_v49 = vmax.f32 %v1073_v48, 0.0 }
 0x3bc   :  { %1502 = vmatmul.mubr.f32.vlgmr.msra.gmra.mxu0 %v1074_v49 }
 0x47c   :  { %v1157_v50 = vpop.f32.mrf.mxu0 }
 0x47d   :  { %v1231_v51 = vmul.f32 %v1157_v50, %v1157_v50  ;;  %1505 = vmatpush3.msra.mxu1 %v1157_v50 }
 0x47e   :  { %v1503_v52 = vpop.f32.mrf.mxu0  ;;  %1507 = vmatmul.mubr.msk.f32.vlgmr.msra.gmra.mxu1 %vm242_vm1, %v1678_v13  ;;  %1509 = vmatprep.subr.mxu1 %v1677_v0 }
 0x47f   :  { %1510 = vmatpush3.msra.mxu1 %v1231_v51  ;;  %1511 = vmatprep.mubr.msk.f32.mxu1 %vm1680_vm2, %v1677_v0 }
 0x482   :  { %1512 = vmatmul.mubr.msk.f32.vlgmr.msra.gmra.mxu1 %vm242_vm1, %v1678_v13 }
 0x53e   :  { %v1227_v53 = vpop.f32.mrf.mxu1 }
 0x53f   :  { %v1302_v54 = vmul.f32 0.125, %v1227_v53 }
 0x540   :  { %v1508_v55 = vpop.f32.mrf.mxu1 }
 0x541   :  { %v1304_v57 = vmul.f32 %v1302_v54, %v1302_v54 }
 0x542   :  { %v1298_v56 = vpop.f32.mrf.mxu1 }
 0x543   :  { %v1303_v58 = vmul.f32 0.125, %v1298_v56 }
 0x544   :  { %v1513_v59 = vpop.f32.mrf.mxu1 }
 0x545   :  { %v1305_v11 = vsub.f32 %v1303_v58, %v1304_v57 }
 0x547   :  { %v1306_v60 = vmax.f32 %v1305_v11, 0.0 }
 0x549   :  { %v1307_v14 = vadd.f32 1e-05, %v1306_v60 }
 0x54b   :  { %1538 = vrsqrt.f32 %v1307_v14 }
 0x558   :  { %v1539_v12 = vpop.eup %1538 }
 0x559   :  { %v1312_v61 = vmul.f32 %v1539_v12, %v1310_v10 }
 0x55b   :  { %v1313_v62 = vmul.f32 %v1312_v61, %v1302_v54  ;;  %v1328_v13 = vrot.slane %v1312_v61, %v1767_v9 }
 0x55d   :  { %v1321_v0 = vrot.slane %v1313_v62, %v1763_v3  ;;  %v1329_v2 = vmul.f32 %v1328_v13, %v1157_v50 }
 0x55f   :  { %v1322_v63 = vrot.slane %v1321_v0, 7 }
 0x561   :  { %v1324_v1 = vsub.f32 %v1310_v10, %v1322_v63 }
 0x563   :  { %v1333_v4 = vrot.slane %v1324_v1, %v1772_v36 }
 0x565   :  { %v1334_v5 = vadd.f32 %v1333_v4, %v1329_v2 }
 0x567   :  { %v1335_v6 = vmax.f32 %v1334_v5, 0.0 }
 0x569   :  { %1336 = vst [vmem:[#allocation11] sm:$0xff] %v1335_v6 }
 0x56a   :  { %1651 = shalt.err (!%p1648_p1)
}
 0x56b   :  { %1346 = dma.vmem_to_hbm [thread:$0]  %s1344_s4, 128, %s1843_s5, [#allocation4]  }
 0x56c   :  { %1666 = dma.done.wait [#allocation4], 128  }
 0x56d   :  { %1667 = vsyncadd [#allocation4], 4294967168 }
 0x56e   :  { %1350 = vsyncpa [#allocation3], 1 }
 0x56f   :  { %1351 = vsyncpa [#allocation6], 1 }
 0x570   :  { %1352 = vsyncpa [#allocation9], 1 }
 0x571   :  { %1353 = vsyncpa [#allocation4], 1 }

</bundles_post_ra>
